<compile_context>
chip_gen: v6e
topology: v6e:2x2x1
jax: 0.10.0
libtpu: 0.0.40
codegen_flags: <defaults>
</compile_context>

<pallas_src>
import jax
import jax.numpy as jnp
from jax.experimental import pallas as pl
from jax.experimental.pallas import tpu as pltpu

EPS = 1e-5


def _frozen_bn_kernel(x_ref, s_ref, b_ref, o_ref):
    # x_ref: (TR, TL); s_ref / b_ref: (TR, 1) f32 per-row scale / bias.
    # Compute in f32 (matches PyTorch buffer math), cast on store.
    x = x_ref[...].astype(jnp.float32)
    o_ref[...] = (x * s_ref[...] + b_ref[...]).astype(o_ref.dtype)


def frozen_batch_norm_2d(x_nchw, weight, bias, running_mean, running_var):
    """x_nchw: (N, C, H, W); params: (C,). Returns (N, C, H, W)."""
    N, C, H, W = x_nchw.shape
    R = N * C          # rows: one per (n, c) pair
    L = H * W          # lanes: flattened spatial

    # Free reshape: NCHW is contiguous as (N*C, H*W).
    x2d = x_nchw.reshape(R, L)

    # Per-channel affine constants in f32, replicated per row.  O(N*C) work,
    # negligible against the N*C*H*W elementwise pass.
    w32 = weight.astype(jnp.float32)
    b32 = bias.astype(jnp.float32)
    rm32 = running_mean.astype(jnp.float32)
    rv32 = running_var.astype(jnp.float32)
    scale_c = w32 * jax.lax.rsqrt(rv32 + EPS)
    bias_c = b32 - rm32 * scale_c
    scale_rows = jnp.tile(scale_c, N).reshape(R, 1)
    bias_rows = jnp.tile(bias_c, N).reshape(R, 1)

    itemsize = jnp.dtype(x2d.dtype).itemsize

    # --- lane tile: multiple of 128 (unmasked vst).  If H*W is not
    # 128-aligned, fall back to the full extent (block dim == array dim is
    # always legal).
    if L % 128 == 0:
        tl = min(L, 4096)
    else:
        tl = L

    # --- row tile: target ~4 MiB per x tile (past the measured roofline
    # knee), rounded to the dtype's native sublane packing (8 for f32, 16 for
    # bf16, 32 for int8).  cdiv grid + elementwise op => padded tail rows are
    # harmless.
    sub = max(8, 32 // itemsize)
    target_rows = max(sub, (4 * 1024 * 1024) // max(1, tl * itemsize))
    if R <= sub:
        tr = R
    else:
        tr = min(R, target_rows)
        tr = max(sub, (tr // sub) * sub)

    grid = (pl.cdiv(R, tr), pl.cdiv(L, tl))
    param_spec = pl.BlockSpec((tr, 1), lambda i, j: (i, 0))

    out2d = pl.pallas_call(
        _frozen_bn_kernel,
        out_shape=jax.ShapeDtypeStruct((R, L), x2d.dtype),
        grid_spec=pltpu.PrefetchScalarGridSpec(
            num_scalar_prefetch=0,
            grid=grid,
            in_specs=[
                pl.BlockSpec((tr, tl), lambda i, j: (i, j)),
                param_spec,
                param_spec,
            ],
            out_specs=pl.BlockSpec((tr, tl), lambda i, j: (i, j)),
        ),
        compiler_params=pltpu.CompilerParams(
            dimension_semantics=("parallel", "parallel"),
            # (x + out) tiles x 2 buffers @ <=4 MiB each (<=16 MiB) + tiny
            # param tiles: fits comfortably under 32 MiB on v5e/v6e/v7x.
            vmem_limit_bytes=32 * 1024 * 1024,
        ),
    )(x2d, scale_rows, bias_rows)

    # Free reshape back to NCHW.
    return out2d.reshape(N, C, H, W)


if __name__ == "__main__":
    key = jax.random.PRNGKey(0)
    N, C, H, W = 2, 4, 16, 16
    kx, kw, kb, km, kv = jax.random.split(key, 5)

    x = jax.random.normal(kx, (N, C, H, W), dtype=jnp.float32)

    # Deterministic "frozen" buffers (module __init__ gives ones/zeros; we
    # perturb them deterministically so the test is non-trivial).
    weight = jnp.ones((C,), jnp.float32) + 0.1 * jax.random.normal(kw, (C,))
    bias = jnp.zeros((C,), jnp.float32) + 0.1 * jax.random.normal(kb, (C,))
    running_mean = 0.1 * jax.random.normal(km, (C,))
    running_var = jnp.ones((C,), jnp.float32) + 0.05 * jnp.abs(
        jax.random.normal(kv, (C,)))

    out = frozen_batch_norm_2d(x, weight, bias, running_mean, running_var)
    out = jax.block_until_ready(out)

    # Pure-JAX reference (same math as the PyTorch forward).
    scale = weight.reshape(1, C, 1, 1) * jax.lax.rsqrt(
        running_var.reshape(1, C, 1, 1) + EPS)
    ref_bias = bias.reshape(1, C, 1, 1) - running_mean.reshape(1, C, 1, 1) * scale
    ref = x * scale + ref_bias

    assert out.shape == (N, C, H, W)
    assert jnp.allclose(out, ref, atol=1e-5, rtol=1e-5)
    print("KERNEL_OK")
</pallas_src>

<mosaic_0001>
module attributes {stable_mosaic.version = 11 : i64} {
  func.func @_frozen_bn_kernel(%arg0: i32, %arg1: i32, %arg2: memref<8x256xf32, #tpu.memory_space<vmem>>, %arg3: memref<8x1xf32, #tpu.memory_space<vmem>>, %arg4: memref<8x1xf32, #tpu.memory_space<vmem>>, %arg5: memref<8x256xf32, #tpu.memory_space<vmem>>) attributes {dimension_semantics = [#tpu.dimension_semantics<parallel>, #tpu.dimension_semantics<parallel>], iteration_bounds = array<i64: 1, 1>, scalar_prefetch = 0 : i64, scratch_operands = 0 : i64, tpu.core_type = #tpu.core_type<tc>, window_params = [{transform_indices = @transform_0, window_bounds = array<i64: 8, 256>}, {transform_indices = @transform_1, window_bounds = array<i64: 8, 1>}, {transform_indices = @transform_2, window_bounds = array<i64: 8, 1>}, {transform_indices = @transform_3, window_bounds = array<i64: 8, 256>}]} {
    %c0 = arith.constant 0 : index
    %c0_0 = arith.constant 0 : index
    %0 = vector.load %arg2[%c0, %c0_0] : memref<8x256xf32, #tpu.memory_space<vmem>>, vector<8x256xf32>
    %c0_1 = arith.constant 0 : index
    %c0_2 = arith.constant 0 : index
    %1 = vector.load %arg3[%c0_1, %c0_2] : memref<8x1xf32, #tpu.memory_space<vmem>>, vector<8x1xf32>
    %2 = vector.broadcast %1 : vector<8x1xf32> to vector<8x256xf32>
    %3 = arith.mulf %0, %2 : vector<8x256xf32>
    %c0_3 = arith.constant 0 : index
    %c0_4 = arith.constant 0 : index
    %4 = vector.load %arg4[%c0_3, %c0_4] : memref<8x1xf32, #tpu.memory_space<vmem>>, vector<8x1xf32>
    %5 = vector.broadcast %4 : vector<8x1xf32> to vector<8x256xf32>
    %6 = arith.addf %3, %5 : vector<8x256xf32>
    %c0_5 = arith.constant 0 : index
    %c0_6 = arith.constant 0 : index
    %7 = vector.load %arg5[%c0_5, %c0_6] : memref<8x256xf32, #tpu.memory_space<vmem>>, vector<8x256xf32>
    tpu.vector_store %arg5[%c0_5, %c0_6], %6 {strides = array<i32>} : memref<8x256xf32, #tpu.memory_space<vmem>>, vector<8x256xf32>,
    return
  }
  func.func @transform_0(%arg0: i32, %arg1: i32) -> (i32, i32) {
    %c0_i32 = arith.constant 0 : i32
    return %arg0, %arg1 : i32, i32
  }
  func.func @transform_1(%arg0: i32, %arg1: i32) -> (i32, i32) {
    %c0_i32 = arith.constant 0 : i32
    %c0_i32_0 = arith.constant 0 : i32
    return %arg0, %c0_i32 : i32, i32
  }
  func.func @transform_2(%arg0: i32, %arg1: i32) -> (i32, i32) {
    %c0_i32 = arith.constant 0 : i32
    %c0_i32_0 = arith.constant 0 : i32
    return %arg0, %c0_i32 : i32, i32
  }
  func.func @transform_3(%arg0: i32, %arg1: i32) -> (i32, i32) {
    %c0_i32 = arith.constant 0 : i32
    return %arg0, %arg1 : i32, i32
  }
}

</mosaic_0001>

<bundles_post_ra>
// kernel: tpu_custom_call.1
= control target key start
LH: loop header
LB: loop body
LE: loop exit
PB: predicated region body
PF: predicated region fallthrough
CT: control target
= control target key end

     0   :  { %v74_v1 = vmov 0   ;;  %s111_s0 = inlined_call_operand.vmem [shape: f32[8,256], index: 0, kind: input, shape index: {}]   ;;  %s112_s1 = inlined_call_operand.vmem [shape: f32[8,1], index: 1, kind: input, shape index: {}]   ;;  %s113_s2 = inlined_call_operand.vmem [shape: f32[8,1], index: 2, kind: input, shape index: {}]   ;;  %s114_s3 = inlined_call_operand.hbm [shape: f32[8,256], index: 3, kind: output, shape index: {}]  }
   0x1   :  { %v17_v0 = vld [vmem:[%s112_s1] sm:$0xff]  ;;  %51 = vset.pattern.permute.xlu0 %v74_v1 }
   0x2   :  { %8 = vsyncpa [#allocation3], 0  ;;  %20 = vperm.xlu0 %51, %v17_v0   ;;  %v25_v2 = vld [vmem:[%s113_s2] sm:$0xff]  ;;  %v16_v5 = vld [vmem:[%s111_s0 + $0x8] sm:$0xff]  ;;  %s75_s20 = smov [#allocation2]  }
   0x3   :  { %v15_v4 = vld [vmem:[%s111_s0] sm:$0xff]  ;;  %s41_s1 = sshll.u32 %s75_s20, 4  ;;  %s42_s1 = int_to_ptr.vmem [resolvable:$true] %s41_s1 }
   0x4   :  { %s52_s2 = scalar_lea.vmem %s42_s1, 256  ;;  %p57_p1 = scmp.lt.s32.totalorder %s42_s1, %s42_s1 }
   0x5   :  { %p53_p0 = scmp.ne.s32.totalorder %s42_s1, %s52_s2  ;;  %p58_p2 = scmp.lt.s32.totalorder %s52_s2, %s52_s2 }
   0x6   :  { %28 = vperm.xlu0 %51, %v25_v2  }
   0x7   :  { %p59_p3 = por %p58_p2, %p57_p1 }
   0x9   :  { %p60_p4 = pnand %p59_p3, %p53_p0 }
  0x7d   :  { %v21_v3 = vpop.permute.xlu0 %20 }
  0x7e   :  { %v23_v6 = vmul.f32 %v21_v3, %v15_v4  ;;  %v24_v7 = vmul.f32 %v21_v3, %v16_v5 }
  0x81   :  { %v29_v8 = vpop.permute.xlu0 %28 }
  0x82   :  { %v31_v9 = vadd.f32 %v29_v8, %v23_v6  ;;  %v32_v10 = vadd.f32 %v29_v8, %v24_v7 }
  0x84   :  { %33 = vst [vmem:[#allocation2] sm:$0xff] %v31_v9  ;;  %34 = vst [vmem:[#allocation2 + $0x8] sm:$0xff] %v32_v10 }
  0x85   :  { %63 = shalt.err (!%p60_p4)
}
  0x86   :  { %44 = dma.vmem_to_hbm [thread:$0]  %s42_s1, 256, %s114_s3, [#allocation3]  }
  0x87   :  { %72 = dma.done.wait [#allocation3], 256  }
  0x88   :  { %73 = vsyncadd [#allocation3], 4294967040 }
  0x89   :  { %48 = vsyncpa [#allocation3], 1 }

</bundles_post_ra>
